<compile_context>
chip_gen: v7x
topology: tpu7x:2x2x1
jax: 0.10.0
libtpu: 0.0.40
codegen_flags: <defaults>
</compile_context>

<pallas_src>
import functools

import jax
import jax.numpy as jnp
from jax.experimental import pallas as pl
from jax.experimental.pallas import tpu as pltpu

_EPS = 1e-5  # torch.nn.LayerNorm default


def _round_up(x, m):
  return ((x + m - 1) // m) * m


def _patch_embed_kernel(x_ref, ln1_ref, w_ref, ln2_ref, o_ref, *, patch_dim):
  # x_ref: (TM, P_pad) rows of patch features (zero-padded past patch_dim).
  x = x_ref[...].astype(jnp.float32)

  ln1 = ln1_ref[...]                    # (2, P_pad): [gamma1; beta1], zero-padded
  g1 = ln1[0:1, :]
  b1 = ln1[1:2, :]

  # --- LayerNorm over the real patch features (one-pass variance) ---
  inv_p = 1.0 / patch_dim
  s = jnp.sum(x, axis=-1, keepdims=True)        # padded lanes are zero
  ss = jnp.sum(x * x, axis=-1, keepdims=True)
  mu = s * inv_p
  var = ss * inv_p - mu * mu
  xn = (x - mu) * jax.lax.rsqrt(var + _EPS)
  xn = xn * g1 + b1                             # padded lanes -> 0 (g1,b1 padded with 0)

  # --- Linear: (TM, P_pad) @ (P_pad, E) in bf16, f32 accumulation (MXU) ---
  y = jnp.dot(xn.astype(jnp.bfloat16), w_ref[...],
              preferred_element_type=jnp.float32)

  ln2 = ln2_ref[...]                    # (3, E): [linear bias; gamma2; beta2]
  y = y + ln2[0:1, :]

  # --- LayerNorm over embedding dim E ---
  mu2 = jnp.mean(y, axis=-1, keepdims=True)
  var2 = jnp.mean(y * y, axis=-1, keepdims=True) - mu2 * mu2
  yn = (y - mu2) * jax.lax.rsqrt(var2 + _EPS)
  o_ref[...] = (yn * ln2[1:2, :] + ln2[2:3, :]).astype(o_ref.dtype)


def _rearrange_patches(x, patch_size):
  """'b c (h p1) (w p2) -> b (h w) (p1 p2 c)' in plain JAX (glue)."""
  b, c, hh, ww = x.shape
  p = patch_size
  h, w = hh // p, ww // p
  x = x.reshape(b, c, h, p, w, p)                # b c h p1 w p2
  x = jnp.transpose(x, (0, 2, 4, 3, 5, 1))       # b h w p1 p2 c
  return x.reshape(b, h * w, p * p * c)


@functools.partial(jax.jit, static_argnames=("patch_size", "tm"))
def patch_embedding(x, params, *, patch_size, tm=512):
  """x: (B, C, H, W) NCHW float32.  Returns (B, N, emb_dim)."""
  g1, b1, w, bias, g2, b2 = params
  patches = _rearrange_patches(x, patch_size)    # (B, N, P)
  B, N, P = patches.shape
  E = w.shape[1]

  # Lane-dense patch-feature dim and large row tiles over flattened (B*N).
  P_pad = _round_up(P, 128)
  rows = B * N
  TM = min(tm, _round_up(rows, 8))               # sublane-aligned row tile
  rows_pad = _round_up(rows, TM)

  x2 = patches.reshape(rows, P)
  x2 = jnp.pad(x2, ((0, rows_pad - rows), (0, P_pad - P)))

  # Packed parameter operands (constant index_maps keep them VMEM-resident).
  ln1 = jnp.stack([jnp.pad(g1, (0, P_pad - P)),
                   jnp.pad(b1, (0, P_pad - P))])                 # (2, P_pad)
  w_b = jnp.pad(w, ((0, P_pad - P), (0, 0))).astype(jnp.bfloat16)  # (P_pad, E)
  ln2 = jnp.stack([bias, g2, b2])                                  # (3, E)

  kernel = functools.partial(_patch_embed_kernel, patch_dim=P)

  out = pl.pallas_call(
      kernel,
      out_shape=jax.ShapeDtypeStruct((rows_pad, E), x.dtype),
      grid_spec=pltpu.PrefetchScalarGridSpec(
          num_scalar_prefetch=0,
          grid=(rows_pad // TM,),
          in_specs=[
              pl.BlockSpec((TM, P_pad), lambda i: (i, 0)),   # patch rows
              pl.BlockSpec((2, P_pad), lambda i: (0, 0)),    # LN1 gamma/beta
              pl.BlockSpec((P_pad, E), lambda i: (0, 0)),    # Linear W (bf16)
              pl.BlockSpec((3, E), lambda i: (0, 0)),        # bias / LN2 gamma/beta
          ],
          out_specs=pl.BlockSpec((TM, E), lambda i: (i, 0)),
      ),
      compiler_params=pltpu.CompilerParams(
          dimension_semantics=("parallel",),
          # Let XLA fuse the rearrange/pad producer into the pallas operand DMA
          # instead of materializing the patches tensor in HBM.
          allow_input_fusion=[True, False, False, False],
          vmem_limit_bytes=48 * 1024 * 1024,
      ),
  )(x2, ln1, w_b, ln2)

  return out[:rows].reshape(B, N, E)


def init_params(key, patch_dim, emb_dim):
  """Deterministic parameter init matching nn.LayerNorm / nn.Linear defaults."""
  kw, kb = jax.random.split(key)
  bound = 1.0 / jnp.sqrt(patch_dim)
  w = jax.random.uniform(kw, (patch_dim, emb_dim), jnp.float32, -bound, bound)
  bias = jax.random.uniform(kb, (emb_dim,), jnp.float32, -bound, bound)
  g1 = jnp.ones((patch_dim,), jnp.float32)
  b1 = jnp.zeros((patch_dim,), jnp.float32)
  g2 = jnp.ones((emb_dim,), jnp.float32)
  b2 = jnp.zeros((emb_dim,), jnp.float32)
  return (g1, b1, w, bias, g2, b2)


def _reference(x, params, patch_size):
  """Pure-JAX f32 reference of the PyTorch forward (for sanity checking)."""
  g1, b1, w, bias, g2, b2 = params

  def ln(t, g, b):
    mu = jnp.mean(t, axis=-1, keepdims=True)
    var = jnp.mean((t - mu) ** 2, axis=-1, keepdims=True)
    return (t - mu) * jax.lax.rsqrt(var + _EPS) * g + b

  p = _rearrange_patches(x, patch_size)
  p = ln(p, g1, b1)
  p = p @ w + bias
  return ln(p, g2, b2)


if __name__ == "__main__":
  # Module config: in_channels=1 (see fidelity note), patch_size=8, emb_dim=128
  in_channels, patch_size, emb_dim = 1, 8, 128
  B, H, W = 2, 32, 32
  patch_dim = patch_size * patch_size * in_channels   # 64

  key = jax.random.PRNGKey(0)
  kx, kp = jax.random.split(key)
  x = jax.random.normal(kx, (B, in_channels, H, W), jnp.float32)
  params = init_params(kp, patch_dim, emb_dim)

  out = patch_embedding(x, params, patch_size=patch_size)
  out = jax.block_until_ready(out)

  ref = _reference(x, params, patch_size)
  N = (H // patch_size) * (W // patch_size)
  assert out.shape == (B, N, emb_dim)
  # bf16 matmul (f32 accumulation): LN2 renormalizes, expect ~1e-3..1e-2 error.
  max_err = float(jnp.max(jnp.abs(out - ref)))
  assert jnp.allclose(out, ref, atol=3e-2, rtol=3e-2), f"max err {max_err}"

  print("KERNEL_OK")
</pallas_src>

<mosaic_0001>
module attributes {stable_mosaic.version = 11 : i64} {
  func.func @_patch_embed_kernel(%arg0: i32, %arg1: memref<32x128xf32, #tpu.memory_space<vmem>>, %arg2: memref<2x128xf32, #tpu.memory_space<vmem>>, %arg3: memref<128x128xbf16, #tpu.memory_space<vmem>>, %arg4: memref<3x128xf32, #tpu.memory_space<vmem>>, %arg5: memref<32x128xf32, #tpu.memory_space<vmem>>) attributes {dimension_semantics = [#tpu.dimension_semantics<parallel>], iteration_bounds = array<i64: 1>, scalar_prefetch = 0 : i64, scratch_operands = 0 : i64, tpu.core_type = #tpu.core_type<tc>, window_params = [{transform_indices = @transform_0, window_bounds = array<i64: 32, 128>}, {pipeline_mode = #tpu.pipeline_mode<synchronous>, transform_indices = @transform_1, window_bounds = array<i64: 2, 128>}, {pipeline_mode = #tpu.pipeline_mode<synchronous>, transform_indices = @transform_2, window_bounds = array<i64: 128, 128>}, {pipeline_mode = #tpu.pipeline_mode<synchronous>, transform_indices = @transform_3, window_bounds = array<i64: 3, 128>}, {transform_indices = @transform_4, window_bounds = array<i64: 32, 128>}]} {
    %c0 = arith.constant 0 : index
    %c0_0 = arith.constant 0 : index
    %0 = vector.load %arg1[%c0, %c0_0] : memref<32x128xf32, #tpu.memory_space<vmem>>, vector<32x128xf32>
    %c0_1 = arith.constant 0 : index
    %c0_2 = arith.constant 0 : index
    %1 = vector.load %arg2[%c0_1, %c0_2] : memref<2x128xf32, #tpu.memory_space<vmem>>, vector<2x128xf32>
    %2 = vector.extract_strided_slice %1 {offsets = [0, 0], sizes = [1, 128], strides = [1, 1]} : vector<2x128xf32> to vector<1x128xf32>
    %3 = vector.extract_strided_slice %1 {offsets = [1, 0], sizes = [1, 128], strides = [1, 1]} : vector<2x128xf32> to vector<1x128xf32>
    %cst = arith.constant dense<0.000000e+00> : vector<32xf32>
    %4 = vector.multi_reduction <add>, %0, %cst [1] : vector<32x128xf32> to vector<32xf32>
    %5 = vector.shape_cast %4 : vector<32xf32> to vector<32x1xf32>
    %6 = arith.mulf %0, %0 : vector<32x128xf32>
    %cst_3 = arith.constant dense<0.000000e+00> : vector<32xf32>
    %7 = vector.multi_reduction <add>, %6, %cst_3 [1] : vector<32x128xf32> to vector<32xf32>
    %8 = vector.shape_cast %7 : vector<32xf32> to vector<32x1xf32>
    %cst_4 = arith.constant 1.562500e-02 : f32
    %9 = vector.broadcast %cst_4 : f32 to vector<32x1xf32>
    %10 = arith.mulf %5, %9 : vector<32x1xf32>
    %cst_5 = arith.constant 1.562500e-02 : f32
    %11 = vector.broadcast %cst_5 : f32 to vector<32x1xf32>
    %12 = arith.mulf %8, %11 : vector<32x1xf32>
    %13 = arith.mulf %10, %10 : vector<32x1xf32>
    %14 = arith.subf %12, %13 : vector<32x1xf32>
    %15 = vector.broadcast %10 : vector<32x1xf32> to vector<32x128xf32>
    %16 = arith.subf %0, %15 : vector<32x128xf32>
    %cst_6 = arith.constant 9.99999974E-6 : f32
    %17 = vector.broadcast %cst_6 : f32 to vector<32x1xf32>
    %18 = arith.addf %14, %17 : vector<32x1xf32>
    %19 = math.rsqrt %18 : vector<32x1xf32>
    %20 = vector.broadcast %19 : vector<32x1xf32> to vector<32x128xf32>
    %21 = arith.mulf %16, %20 : vector<32x128xf32>
    %22 = vector.broadcast %2 : vector<1x128xf32> to vector<32x128xf32>
    %23 = arith.mulf %21, %22 : vector<32x128xf32>
    %24 = vector.broadcast %3 : vector<1x128xf32> to vector<32x128xf32>
    %25 = arith.addf %23, %24 : vector<32x128xf32>
    %26 = arith.truncf %25 : vector<32x128xf32> to vector<32x128xbf16>
    %c0_7 = arith.constant 0 : index
    %c0_8 = arith.constant 0 : index
    %27 = vector.load %arg3[%c0_7, %c0_8] : memref<128x128xbf16, #tpu.memory_space<vmem>>, vector<128x128xbf16>
    %cst_9 = arith.constant dense<0.000000e+00> : vector<32x128xf32>
    %28 = tpu.matmul %26, %27, %cst_9 {dimension_numbers = #tpu.dot_dimension_numbers<[1], [0], [0], [1], [0, 0, 1, 1], [], []>} : vector<32x128xbf16>, vector<128x128xbf16>, vector<32x128xf32> -> vector<32x128xf32>
    %c0_10 = arith.constant 0 : index
    %c0_11 = arith.constant 0 : index
    %29 = vector.load %arg4[%c0_10, %c0_11] : memref<3x128xf32, #tpu.memory_space<vmem>>, vector<3x128xf32>
    %30 = vector.extract_strided_slice %29 {offsets = [0, 0], sizes = [1, 128], strides = [1, 1]} : vector<3x128xf32> to vector<1x128xf32>
    %31 = vector.broadcast %30 : vector<1x128xf32> to vector<32x128xf32>
    %32 = arith.addf %28, %31 : vector<32x128xf32>
    %cst_12 = arith.constant dense<0.000000e+00> : vector<32xf32>
    %33 = vector.multi_reduction <add>, %32, %cst_12 [1] : vector<32x128xf32> to vector<32xf32>
    %34 = vector.shape_cast %33 : vector<32xf32> to vector<32x1xf32>
    %cst_13 = arith.constant 1.280000e+02 : f32
    %35 = vector.broadcast %cst_13 : f32 to vector<32x1xf32>
    %36 = arith.divf %34, %35 : vector<32x1xf32>
    %37 = arith.mulf %32, %32 : vector<32x128xf32>
    %cst_14 = arith.constant dense<0.000000e+00> : vector<32xf32>
    %38 = vector.multi_reduction <add>, %37, %cst_14 [1] : vector<32x128xf32> to vector<32xf32>
    %39 = vector.shape_cast %38 : vector<32xf32> to vector<32x1xf32>
    %cst_15 = arith.constant 1.280000e+02 : f32
    %40 = vector.broadcast %cst_15 : f32 to vector<32x1xf32>
    %41 = arith.divf %39, %40 : vector<32x1xf32>
    %42 = arith.mulf %36, %36 : vector<32x1xf32>
    %43 = arith.subf %41, %42 : vector<32x1xf32>
    %44 = vector.broadcast %36 : vector<32x1xf32> to vector<32x128xf32>
    %45 = arith.subf %32, %44 : vector<32x128xf32>
    %cst_16 = arith.constant 9.99999974E-6 : f32
    %46 = vector.broadcast %cst_16 : f32 to vector<32x1xf32>
    %47 = arith.addf %43, %46 : vector<32x1xf32>
    %48 = math.rsqrt %47 : vector<32x1xf32>
    %49 = vector.broadcast %48 : vector<32x1xf32> to vector<32x128xf32>
    %50 = arith.mulf %45, %49 : vector<32x128xf32>
    %51 = vector.extract_strided_slice %29 {offsets = [1, 0], sizes = [1, 128], strides = [1, 1]} : vector<3x128xf32> to vector<1x128xf32>
    %52 = vector.broadcast %51 : vector<1x128xf32> to vector<32x128xf32>
    %53 = arith.mulf %50, %52 : vector<32x128xf32>
    %54 = vector.extract_strided_slice %29 {offsets = [2, 0], sizes = [1, 128], strides = [1, 1]} : vector<3x128xf32> to vector<1x128xf32>
    %55 = vector.broadcast %54 : vector<1x128xf32> to vector<32x128xf32>
    %56 = arith.addf %53, %55 : vector<32x128xf32>
    %c0_17 = arith.constant 0 : index
    %c0_18 = arith.constant 0 : index
    %57 = vector.load %arg5[%c0_17, %c0_18] : memref<32x128xf32, #tpu.memory_space<vmem>>, vector<32x128xf32>
    tpu.vector_store %arg5[%c0_17, %c0_18], %56 {strides = array<i32>} : memref<32x128xf32, #tpu.memory_space<vmem>>, vector<32x128xf32>,
    return
  }
  func.func @transform_0(%arg0: i32) -> (i32, i32) {
    %c0_i32 = arith.constant 0 : i32
    %c0_i32_0 = arith.constant 0 : i32
    return %arg0, %c0_i32 : i32, i32
  }
  func.func @transform_1(%arg0: i32) -> (i32, i32) {
    %c0_i32 = arith.constant 0 : i32
    %c0_i32_0 = arith.constant 0 : i32
    %c0_i32_1 = arith.constant 0 : i32
    return %c0_i32, %c0_i32_0 : i32, i32
  }
  func.func @transform_2(%arg0: i32) -> (i32, i32) {
    %c0_i32 = arith.constant 0 : i32
    %c0_i32_0 = arith.constant 0 : i32
    %c0_i32_1 = arith.constant 0 : i32
    return %c0_i32, %c0_i32_0 : i32, i32
  }
  func.func @transform_3(%arg0: i32) -> (i32, i32) {
    %c0_i32 = arith.constant 0 : i32
    %c0_i32_0 = arith.constant 0 : i32
    %c0_i32_1 = arith.constant 0 : i32
    return %c0_i32, %c0_i32_0 : i32, i32
  }
  func.func @transform_4(%arg0: i32) -> (i32, i32) {
    %c0_i32 = arith.constant 0 : i32
    %c0_i32_0 = arith.constant 0 : i32
    return %arg0, %c0_i32 : i32, i32
  }
}

</mosaic_0001>

<bundles_post_ra>
// kernel: patch_embedding.2
= control target key start
LH: loop header
LB: loop body
LE: loop exit
PB: predicated region body
PF: predicated region fallthrough
CT: control target
= control target key end

     0   :  { %s570_s0 = inlined_call_operand.vmem [shape: f32[2,128], index: 0, kind: input, shape index: {}]   ;;  %s571_s1 = inlined_call_operand.vmem [shape: bf16[128,128], index: 1, kind: input, shape index: {}]   ;;  %s572_s2 = inlined_call_operand.vmem [shape: f32[3,128], index: 2, kind: input, shape index: {}]   ;;  %s573_s3 = inlined_call_operand.vmem [shape: f32[32,64], index: 3, kind: input, shape index: {}]   ;;  %s574_s4 = inlined_call_operand.<no memory space> [shape: f32[], index: 4, kind: input, shape index: {}]   ;;  %s575_s5 = inlined_call_operand.hbm [shape: f32[32,128], index: 5, kind: output, shape index: {}]  }
   0x1   :  { %v10_v0 = vstv %s574_s4 }
   0x2   :  { %v21_v1 = vlaneseq  ;;  %v342_v2 = vld [vmem:[%s573_s3 + $0x10] sm:$0xff]  ;;  %v20_v3 = vld [vmem:[%s573_s3] sm:$0xff]  ;;  %v343_v5 = vld [vmem:[%s573_s3 + $0x18] sm:$0xff] }
   0x3   :  { %v341_v6 = vld [vmem:[%s573_s3 + $0x8] sm:$0xff] }
   0x4   :  { %v22_v4 = vand.u32 127, %v21_v1 }
   0x6   :  { %vm24_vm0 = vcmp.lt.s32.totalorder %v22_v4, 64 }
   0x7   :  { %v482_v7 = vsel %vm24_vm0, %v342_v2, %v10_v0  ;;  %v484_v8 = vsel %vm24_vm0, %v20_v3, %v10_v0  ;;  %v488_v9 = vsel %vm24_vm0, %v343_v5, %v10_v0  ;;  %v490_v10 = vsel %vm24_vm0, %v341_v6, %v10_v0 }
   0x8   :  { %68 = vadd.xlane.f32.xlu1 %v482_v7  ;;  %64 = vadd.xlane.f32.xlu0 %v484_v8 }
   0x9   :  { %11 = vsyncpa [#allocation8], 0  ;;  %v73_v11 = vmul.f32 %v490_v10, %v490_v10  ;;  %v72_v12 = vmul.f32 %v484_v8, %v484_v8  ;;  %v75_v13 = vmul.f32 %v488_v9, %v488_v9  ;;  %v74_v14 = vmul.f32 %v482_v7, %v482_v7  ;;  %v385_v15 = vld [vmem:[%s571_s1] sm:$0xff]   ;;  %v386_v16 = vld [vmem:[%s571_s1 + $0x8] sm:$0xff]  }
   0xa   :  { %362 = vmatprep.subr.bf16.mxu0 %v385_v15  ;;  %v387_v17 = vld [vmem:[%s571_s1 + $0x10] sm:$0xff]   ;;  %v388_v18 = vld [vmem:[%s571_s1 + $0x18] sm:$0xff]   ;;  %v389_v19 = vld [vmem:[%s571_s1 + $0x20] sm:$0xff]   ;;  %v527_v49 = vshrl.u32 %v21_v1, 7 }
   0xb   :  { %363 = vmatpush3.bf16.msra.mxu0 %v385_v15  ;;  %v390_v20 = vld [vmem:[%s571_s1 + $0x28] sm:$0xff]   ;;  %v391_v21 = vld [vmem:[%s571_s1 + $0x30] sm:$0xff]   ;;  %v392_v22 = vld [vmem:[%s571_s1 + $0x38] sm:$0xff]  }
   0xc   :  { %70 = vadd.xlane.f32.xlu1 %v488_v9  ;;  %66 = vadd.xlane.f32.xlu0 %v490_v10  ;;  %v118_v52 = vsub.s32 0, %v527_v49  ;;  %v63_v53 = vld [vmem:[%s570_s0] sm:$0x3]  ;;  %v126_v54 = vsub.s32 1, %v527_v49 }
   0xd   :  { %364 = vmatprep.subr.bf16.mxu0 %v386_v16 }
   0xe   :  { %v119_v56 = vrot.slane %v63_v53, %v118_v52  ;;  %v127_v61 = vrot.slane %v63_v53, %v126_v54 }
   0xf   :  { %365 = vmatpush3.bf16.msra.mxu0 %v386_v16 }
  0x10   :  { %78 = vadd.xlane.f32.xlu1 %v73_v11  ;;  %76 = vadd.xlane.f32.xlu0 %v72_v12 }
  0x11   :  { %366 = vmatprep.subr.bf16.mxu0 %v387_v17 }
  0x13   :  { %367 = vmatpush3.bf16.msra.mxu0 %v387_v17 }
  0x14   :  { %82 = vadd.xlane.f32.xlu1 %v75_v13  ;;  %80 = vadd.xlane.f32.xlu0 %v74_v14 }
  0x15   :  { %368 = vmatprep.subr.bf16.mxu0 %v388_v18 }
  0x17   :  { %369 = vmatpush3.bf16.msra.mxu0 %v388_v18 }
  0x18   :  { %370 = vmatprep.subr.bf16.mxu0 %v389_v19 }
  0x1b   :  { %371 = vmatpush3.bf16.msra.mxu0 %v389_v19 }
  0x1c   :  { %372 = vmatprep.subr.bf16.mxu0 %v390_v20 }
  0x1f   :  { %373 = vmatpush3.bf16.msra.mxu0 %v390_v20 }
  0x20   :  { %374 = vmatprep.subr.bf16.mxu0 %v391_v21 }
  0x23   :  { %375 = vmatpush3.bf16.msra.mxu0 %v391_v21 }
  0x24   :  { %376 = vmatprep.subr.bf16.mxu0 %v392_v22 }
  0x27   :  { %377 = vmatpush3.bf16.msra.mxu0 %v392_v22 }
  0x95   :  { %v69_v23 = vpop.xlane.xlu1 %68  ;;  %v65_v24 = vpop.xlane.xlu0 %64 }
  0x96   :  { %v84_v27 = vmul.f32 0.015625, %v65_v24  ;;  %v86_v29 = vmul.f32 0.015625, %v69_v23 }
  0x98   :  { %v92_v33 = vmul.f32 %v84_v27, %v84_v27  ;;  %v94_v39 = vmul.f32 %v86_v29, %v86_v29  ;;  %v100_v58 = vsub.f32 %v484_v8, %v84_v27  ;;  %v102_v2 = vsub.f32 %v482_v7, %v86_v29 }
  0x99   :  { %v71_v25 = vpop.xlane.xlu1 %70  ;;  %v67_v26 = vpop.xlane.xlu0 %66 }
  0x9a   :  { %v85_v28 = vmul.f32 0.015625, %v67_v26  ;;  %v87_v30 = vmul.f32 0.015625, %v71_v25 }
  0x9c   :  { %v93_v34 = vmul.f32 %v85_v28, %v85_v28  ;;  %v95_v40 = vmul.f32 %v87_v30, %v87_v30  ;;  %v101_v55 = vsub.f32 %v490_v10, %v85_v28  ;;  %v103_v63 = vsub.f32 %v488_v9, %v87_v30  ;;  %v150_v9 = vld [vmem:[%s572_s2] sm:$0x7]  ;;  %s433_s2 = smov [#allocation7]  }
  0x9d   :  { %v79_v31 = vpop.xlane.xlu1 %78  ;;  %v77_v32 = vpop.xlane.xlu0 %76  ;;  %v154_v17 = vrot.slane %v150_v9, %v118_v52  ;;  %s330_s19 = sshll.u32 %s433_s2, 4  ;;  %s331_s19 = int_to_ptr.vmem [resolvable:$true] %s330_s19 }
  0x9e   :  { %v89_v35 = vmul.f32 0.015625, %v79_v31  ;;  %v88_v36 = vmul.f32 0.015625, %v77_v32  ;;  %s409_s20 = scalar_lea.vmem %s331_s19, 512  ;;  %p414_p1 = scmp.lt.s32.totalorder %s331_s19, %s331_s19 }
  0x9f   :  { %p410_p0 = scmp.ne.s32.totalorder %s331_s19, %s409_s20  ;;  %p415_p2 = scmp.lt.s32.totalorder %s409_s20, %s409_s20 }
  0xa0   :  { %v97_v37 = vsub.f32 %v89_v35, %v93_v34  ;;  %v96_v38 = vsub.f32 %v88_v36, %v92_v33 }
  0xa1   :  { %v83_v41 = vpop.xlane.xlu1 %82  ;;  %v81_v42 = vpop.xlane.xlu0 %80  ;;  %p416_p3 = por %p415_p2, %p414_p1 }
  0xa2   :  { %v105_v43 = vadd.f32 1e-05, %v97_v37  ;;  %v104_v44 = vadd.f32 1e-05, %v96_v38  ;;  %v91_v45 = vmul.f32 0.015625, %v83_v41  ;;  %v90_v46 = vmul.f32 0.015625, %v81_v42 }
  0xa3   :  { %p417_p4 = pnand %p416_p3, %p410_p0 }
  0xa4   :  { %393 = vrsqrt.f32 %v105_v43  ;;  %v99_v47 = vsub.f32 %v91_v45, %v95_v40  ;;  %v98_v48 = vsub.f32 %v90_v46, %v94_v39 }
  0xa5   :  { %395 = vrsqrt.f32 %v104_v44 }
  0xa6   :  { %v107_v50 = vadd.f32 1e-05, %v99_v47  ;;  %v106_v51 = vadd.f32 1e-05, %v98_v48 }
  0xa8   :  { %397 = vrsqrt.f32 %v107_v50 }
  0xa9   :  { %399 = vrsqrt.f32 %v106_v51 }
  0xae   :  { %v394_v57 = vpop.eup %393 }
  0xaf   :  { %v396_v59 = vpop.eup %395  ;;  %v113_v60 = vmul.f32 %v394_v57, %v101_v55 }
  0xb0   :  { %v112_v62 = vmul.f32 %v396_v59, %v100_v58  ;;  %v315_v59 = vsub.s32 2, %v527_v49 }
  0xb1   :  { %v121_v0 = vmul.f32 %v119_v56, %v113_v60  ;;  %v308_v60 = vrot.slane %v150_v9, %v126_v54 }
  0xb2   :  { %v398_v1 = vpop.eup %397  ;;  %v120_v3 = vmul.f32 %v119_v56, %v112_v62 }
  0xb3   :  { %v400_v4 = vpop.eup %399  ;;  %v129_v5 = vadd.f32 %v127_v61, %v121_v0  ;;  %v115_v6 = vmul.f32 %v398_v1, %v103_v63  ;;  %v316_v63 = vrot.slane %v150_v9, %v315_v59 }
  0xb4   :  { %v128_v10 = vadd.f32 %v127_v61, %v120_v3  ;;  %v114_v11 = vmul.f32 %v400_v4, %v102_v2 }
  0xb5   :  { %v123_v12 = vmul.f32 %v119_v56, %v115_v6 }
  0xb6   :  { %v132_v8 = vpack.c.bf16 %v129_v5, %v128_v10  ;;  %v122_v13 = vmul.f32 %v119_v56, %v114_v11 }
  0xb7   :  { %v131_v14 = vadd.f32 %v127_v61, %v123_v12 }
  0xb8   :  { %378 = vmatprep.mubr.bf16.mxu0 %v132_v8  ;;  %v130_v15 = vadd.f32 %v127_v61, %v122_v13 }
  0xba   :  { %v133_v16 = vpack.c.bf16 %v131_v14, %v130_v15 }
  0xbc   :  { %379 = vmatmul.mubr.bf16.vlgmr.msra.gmra.mrb[0].mxu0 %v133_v16 }
 0x18f   :  { %v380_v7 = vpop.f32.mrb[0].mxu0 }
 0x190   :  { %v543_v18 = vadd.f32 %v380_v7, %v154_v17  ;;  %v237_v19 = vpop.f32.mrb[1].mxu0 }
 0x191   :  { %v238_v20 = vadd.f32 %v237_v19, %v154_v17  ;;  %v381_v21 = vpop.f32.mrb[2].mxu0 }
 0x192   :  { %v545_v22 = vadd.f32 %v381_v21, %v154_v17  ;;  %256 = vadd.xlane.f32.xlu0 %v543_v18  ;;  %v240_v23 = vpop.f32.mrb[3].mxu0  ;;  %v267_v27 = vmul.f32 %v543_v18, %v543_v18 }
 0x193   :  { %v241_v24 = vadd.f32 %v240_v23, %v154_v17  ;;  %v265_v25 = vmul.f32 %v238_v20, %v238_v20 }
 0x194   :  { %258 = vadd.xlane.f32.xlu1 %v545_v22  ;;  %v268_v28 = vmul.f32 %v545_v22, %v545_v22 }
 0x195   :  { %v266_v26 = vmul.f32 %v241_v24, %v241_v24 }
 0x196   :  { %252 = vadd.xlane.f32.xlu0 %v238_v20 }
 0x198   :  { %254 = vadd.xlane.f32.xlu1 %v241_v24 }
 0x19a   :  { %269 = vadd.xlane.f32.xlu0 %v265_v25 }
 0x19c   :  { %271 = vadd.xlane.f32.xlu1 %v266_v26 }
 0x19e   :  { %273 = vadd.xlane.f32.xlu0 %v267_v27 }
 0x1a0   :  { %275 = vadd.xlane.f32.xlu1 %v268_v28 }
 0x21f   :  { %v257_v29 = vpop.xlane.xlu0 %256 }
 0x220   :  { %v263_v36 = vmul.f32 0.0078125, %v257_v29 }
 0x221   :  { %v259_v30 = vpop.xlane.xlu1 %258 }
 0x222   :  { %v264_v39 = vmul.f32 0.0078125, %v259_v30  ;;  %v283_v45 = vmul.f32 %v263_v36, %v263_v36  ;;  %v291_v3 = vsub.f32 %v543_v18, %v263_v36 }
 0x223   :  { %v253_v31 = vpop.xlane.xlu0 %252 }
 0x224   :  { %v261_v32 = vmul.f32 0.0078125, %v253_v31  ;;  %v284_v50 = vmul.f32 %v264_v39, %v264_v39  ;;  %v292_v10 = vsub.f32 %v545_v22, %v264_v39 }
 0x225   :  { %v255_v33 = vpop.xlane.xlu1 %254 }
 0x226   :  { %v262_v34 = vmul.f32 0.0078125, %v255_v33  ;;  %v281_v37 = vmul.f32 %v261_v32, %v261_v32  ;;  %v289_v61 = vsub.f32 %v238_v20, %v261_v32 }
 0x227   :  { %v270_v35 = vpop.xlane.xlu0 %269 }
 0x228   :  { %v277_v38 = vmul.f32 0.0078125, %v270_v35  ;;  %v282_v41 = vmul.f32 %v262_v34, %v262_v34  ;;  %v290_v0 = vsub.f32 %v241_v24, %v262_v34 }
 0x229   :  { %v272_v40 = vpop.xlane.xlu1 %271 }
 0x22a   :  { %v285_v42 = vsub.f32 %v277_v38, %v281_v37  ;;  %v278_v43 = vmul.f32 0.0078125, %v272_v40 }
 0x22b   :  { %v274_v44 = vpop.xlane.xlu0 %273 }
 0x22c   :  { %v293_v46 = vadd.f32 1e-05, %v285_v42  ;;  %v286_v47 = vsub.f32 %v278_v43, %v282_v41  ;;  %v279_v48 = vmul.f32 0.0078125, %v274_v44 }
 0x22d   :  { %v276_v51 = vpop.xlane.xlu1 %275 }
 0x22e   :  { %401 = vrsqrt.f32 %v293_v46  ;;  %v294_v52 = vadd.f32 1e-05, %v286_v47  ;;  %v287_v53 = vsub.f32 %v279_v48, %v283_v45  ;;  %v280_v55 = vmul.f32 0.0078125, %v276_v51 }
 0x230   :  { %403 = vrsqrt.f32 %v294_v52  ;;  %v295_v56 = vadd.f32 1e-05, %v287_v53  ;;  %v288_v57 = vsub.f32 %v280_v55, %v284_v50 }
 0x232   :  { %405 = vrsqrt.f32 %v295_v56  ;;  %v296_v58 = vadd.f32 1e-05, %v288_v57 }
 0x234   :  { %407 = vrsqrt.f32 %v296_v58 }
 0x238   :  { %v402_v62 = vpop.eup %401 }
 0x239   :  { %v301_v1 = vmul.f32 %v402_v62, %v289_v61 }
 0x23a   :  { %v404_v2 = vpop.eup %403 }
 0x23b   :  { %v309_v4 = vmul.f32 %v308_v60, %v301_v1  ;;  %v302_v5 = vmul.f32 %v404_v2, %v290_v0 }
 0x23c   :  { %v406_v6 = vpop.eup %405 }
 0x23d   :  { %v310_v11 = vmul.f32 %v308_v60, %v302_v5  ;;  %v303_v12 = vmul.f32 %v406_v6, %v291_v3  ;;  %v317_v8 = vadd.f32 %v316_v63, %v309_v4 }
 0x23e   :  { %v408_v13 = vpop.eup %407 }
 0x23f   :  { %v311_v14 = vmul.f32 %v308_v60, %v303_v12  ;;  %v304_v49 = vmul.f32 %v408_v13, %v292_v10  ;;  %v318_v54 = vadd.f32 %v316_v63, %v310_v11  ;;  %321 = vst [vmem:[#allocation7] sm:$0xff] %v317_v8 }
 0x241   :  { %v312_v15 = vmul.f32 %v308_v60, %v304_v49  ;;  %v319_v16 = vadd.f32 %v316_v63, %v311_v14  ;;  %322 = vst [vmem:[#allocation7 + $0x8] sm:$0xff] %v318_v54 }
 0x243   :  { %v320_v9 = vadd.f32 %v316_v63, %v312_v15  ;;  %323 = vst [vmem:[#allocation7 + $0x10] sm:$0xff] %v319_v16 }
 0x245   :  { %324 = vst [vmem:[#allocation7 + $0x18] sm:$0xff] %v320_v9 }
 0x246   :  { %420 = shalt.err (!%p417_p4)
}
 0x247   :  { %s421_s23 = scalar_lea.hbm %s575_s5, 512 }
 0x248   :  { %p422_p5 = scmp.ne.s32.totalorder %s575_s5, %s421_s23  ;;  %p425_p6 = scmp.lt.u32.totalorder %s421_s23, %s575_s5 }
 0x24a   :  { %p427_p7 = pnand %p425_p6, %p422_p5 }
 0x24c   :  { %430 = shalt.err (!%p427_p7)
}
 0x24d   :  { %s434_s3 = smov 128   ;;  %s435_s4 = smov 8  }
 0x24e   :  { %336 = dma.vmem_to_hbm [thread:$0]  %s331_s19, 512, %s575_s5, [#allocation8], %s434_s3, %s434_s3, %s435_s4  }
 0x24f   :  { %431 = dma.done.wait [#allocation8], 512  }
 0x250   :  { %432 = vsyncadd [#allocation8], 4294966784 }
 0x251   :  { %340 = vsyncpa [#allocation8], 1 }

</bundles_post_ra>
